<compile_context>
chip_gen: v5e
topology: v5e:2x2
jax: 0.10.0
libtpu: 0.0.40
codegen_flags: <defaults>
</compile_context>

<pallas_src>
import jax
import jax.numpy as jnp
import numpy as np
from jax.experimental import pallas as pl
from jax.experimental.pallas import tpu as pltpu


def _round_up(x, m):
    return ((x + m - 1) // m) * m


def entity_encoder_pooler_kernel(h_ref, m_ref, w1_ref, b1_ref, w2_ref, b2_ref, o_ref):
    """One batch tile: masked avg-pool over seq + Linear -> LeakyReLU -> Linear.

    h_ref : (TB, S, H) native dtype  last hidden states tile (streamed per grid step)
    m_ref : (TB, S)    native dtype  0/1 attention mask tile (streamed per grid step)
    w1_ref: (H, H) bf16, b1_ref: (1, H) f32   (VMEM-resident across the grid)
    w2_ref: (H, O) bf16, b2_ref: (1, O) f32   (VMEM-resident across the grid)
    o_ref : (TB, O) f32
    """
    h = h_ref[...].astype(jnp.bfloat16)              # no-op if backbone already emits bf16
    m_f32 = m_ref[...].astype(jnp.float32)           # (TB, S)

    # Masked sum over the sequence on the MXU: batched (1,S)x(S,H) matmuls, f32 accumulation.
    # NOTE: mask is cast to bf16 for the contraction — exact only for 0/1 attention masks.
    # TODO(synk): on v7x, bundle-verify this q=1 MXU GEMV path still hides under the HBM DMA;
    # if it becomes the critical path there, switch to a chunked VPU multiply + f32 accumulate
    # over S (or lax.dot_general((TB,S),(TB,S,H)) with batch dims) and keep the MXU for the FFN.
    mq = m_f32.astype(h.dtype)[:, None, :]           # (TB, 1, S) bf16
    summed = jnp.einsum(
        "bqs,bsh->bqh", mq, h, preferred_element_type=jnp.float32
    )[:, 0, :]                                       # (TB, H) f32

    # Valid-token count with torch.clamp(min=1e-9); one exact reciprocal per row, then a
    # lane-broadcast multiply (full-tensor divide is the slow path; approx would eat tolerance).
    cnt = jnp.sum(m_f32, axis=1, keepdims=True)      # (TB, 1) f32, exact for 0/1 mask
    inv = 1.0 / jnp.maximum(cnt, 1e-9)
    pooled = summed * inv                            # (TB, H) f32

    # FFN: Linear(H,H) -> LeakyReLU(0.01) -> Linear(H,O); bf16 MXU operands (native fast path
    # on all generations, v5e has no f32 MXU), f32 accumulation + f32 bias adds.
    z = jnp.dot(pooled.astype(jnp.bfloat16), w1_ref[...],
                preferred_element_type=jnp.float32) + b1_ref[...]
    z = jnp.where(z > 0, z, 0.01 * z)                # nn.LeakyReLU default slope
    out = jnp.dot(z.astype(jnp.bfloat16), w2_ref[...],
                  preferred_element_type=jnp.float32) + b2_ref[...]
    o_ref[...] = out.astype(o_ref.dtype)


def _default_vmem_budget():
    """VMEM budget = physical capacity minus headroom for compiler scratch/semaphores/spill.

    128 MiB parts (v5e/v6e) -> ~104 MiB; 64 MiB per-TC (v7x) -> ~40 MiB.
    """
    cap = 64 * 1024 * 1024
    try:
        info = pltpu.get_tpu_info()
        cap = int(getattr(info, "vmem_capacity_bytes", cap) or cap)
    except Exception:
        pass
    return max(cap - 24 * 1024 * 1024, cap // 2)


def _choose_block_b(batch, seq, hidden, out_dim, h_bytes, m_bytes,
                    max_block_b, vmem_budget_bytes):
    """Pick the batch tile: fits VMEM double-buffered, near-equal tiles, even step count."""
    # VMEM-resident (double-buffered) bf16 weights + f32 biases.
    fixed = 2 * (2 * hidden * (hidden + out_dim) + 4 * (hidden + out_dim))
    # Per batch row, double-buffered: native-dtype hidden tile + mask tile + f32 output tile.
    per_row = 2 * (seq * hidden * h_bytes + seq * m_bytes + out_dim * 4)
    tb_max = (vmem_budget_bytes - fixed) // max(per_row, 1)
    tb_max = max(8, (tb_max // 8) * 8)
    tb_max = min(tb_max, max_block_b)

    if batch <= tb_max:
        if batch >= 16:
            # Whole batch fits one tile; split into 2 near-equal tiles so both v7x
            # TensorCores get work (one extra ~0.35us grid step is noise on v5e/v6e).
            return min(_round_up(pl.cdiv(batch, 2), 8), tb_max)
        return batch                                  # single full-extent block

    steps = pl.cdiv(batch, tb_max)
    if steps % 2 == 1:
        steps += 1                                    # even grid => both v7x TCs stay busy
    tb = min(_round_up(pl.cdiv(batch, steps), 8), tb_max)
    # Prefer tb a multiple of 256 (fills the MXU M dim) if it fits and adds no steps.
    if tb > 256:
        tb_256 = min(_round_up(tb, 256), (tb_max // 256) * 256)
        if tb_256 >= tb and pl.cdiv(batch, tb_256) == pl.cdiv(batch, tb):
            tb = tb_256
    return tb


def entity_encoder_pooler(hidden_states, attention_mask, w1, b1, w2, b2,
                          *, block_b=1024, vmem_budget_bytes=None):
    """Batch-tiled Pallas call. hidden_states: (B, S, H); attention_mask: (B, S) (0/1)."""
    B, S, H = hidden_states.shape
    O = w2.shape[1]
    if vmem_budget_bytes is None:
        vmem_budget_bytes = _default_vmem_budget()

    # Hidden states and mask are streamed in their incoming dtype (no standalone HBM cast);
    # only the tiny VMEM-resident parameters are cast here.
    w1 = w1.astype(jnp.bfloat16)
    w2 = w2.astype(jnp.bfloat16)
    b1 = b1.reshape(1, -1).astype(jnp.float32)
    b2 = b2.reshape(1, -1).astype(jnp.float32)

    tb = _choose_block_b(B, S, H, O,
                         jnp.dtype(hidden_states.dtype).itemsize,
                         jnp.dtype(attention_mask.dtype).itemsize,
                         block_b, vmem_budget_bytes)

    return pl.pallas_call(
        entity_encoder_pooler_kernel,
        out_shape=jax.ShapeDtypeStruct((B, O), jnp.float32),
        grid=(pl.cdiv(B, tb),),                       # partial last block handled by Pallas
        in_specs=[
            pl.BlockSpec((tb, S, H), lambda i: (i, 0, 0)),   # streamed hidden tile
            pl.BlockSpec((tb, S), lambda i: (i, 0)),         # streamed mask tile
            pl.BlockSpec((H, H), lambda i: (0, 0)),          # VMEM-resident weights/biases
            pl.BlockSpec((1, H), lambda i: (0, 0)),
            pl.BlockSpec((H, O), lambda i: (0, 0)),
            pl.BlockSpec((1, O), lambda i: (0, 0)),
        ],
        out_specs=pl.BlockSpec((tb, O), lambda i: (i, 0)),
        compiler_params=pltpu.CompilerParams(
            dimension_semantics=("parallel",),               # batch tiles across TCs (v7x)
            vmem_limit_bytes=int(vmem_budget_bytes),
        ),
    )(hidden_states, attention_mask, w1, b1, w2, b2)


def xavier_uniform(key, fan_in, fan_out):
    bound = float(np.sqrt(6.0 / (fan_in + fan_out)))
    return jax.random.uniform(key, (fan_in, fan_out), jnp.float32, -bound, bound)


def reference_pooler(h, m, w1, b1, w2, b2):
    """Pure-JAX reference mirroring the PyTorch encoder_pooler (eval mode), f32 math."""
    hf = h.astype(jnp.float32)
    mf = m.astype(jnp.float32)[:, :, None]
    pooled = jnp.sum(hf * mf, axis=1) / jnp.clip(jnp.sum(mf, axis=1), 1e-9)
    z = pooled @ w1 + b1
    z = jnp.where(z > 0, z, 0.01 * z)
    return z @ w2 + b2


if __name__ == "__main__":
    # bert-mini hidden size is 256; EntityEncoder default output_dim=256. Small batch/seq demo.
    B, S, H, O = 2, 8, 256, 256

    key = jax.random.PRNGKey(0)
    k_h, k_m, k_w1, k_w2 = jax.random.split(key, 4)

    # BERT-mini last_hidden_state as it would come off a TPU backbone: bfloat16.
    hidden_states = jax.random.normal(k_h, (B, S, H), jnp.float32).astype(jnp.bfloat16)
    # 0/1 attention mask with at least the first token valid (native f32, no wrapper cast).
    attention_mask = (jax.random.uniform(k_m, (B, S)) > 0.3).astype(jnp.float32)
    attention_mask = attention_mask.at[:, 0].set(1.0)

    # Deterministic parameter init matching the module: xavier_uniform_ weights, 0.01 biases.
    w1 = xavier_uniform(k_w1, H, H)
    b1 = jnp.full((H,), 0.01, jnp.float32)
    w2 = xavier_uniform(k_w2, H, O)
    b2 = jnp.full((O,), 0.01, jnp.float32)

    out = entity_encoder_pooler(hidden_states, attention_mask, w1, b1, w2, b2)
    out = jax.block_until_ready(out)

    ref = reference_pooler(hidden_states, attention_mask, w1, b1, w2, b2)
    assert out.shape == (B, O)
    # bf16 inputs + bf16 MXU operands (f32 accumulation) on the kernel path: bf16-class tolerance.
    np.testing.assert_allclose(np.asarray(out), np.asarray(ref), rtol=2e-2, atol=2e-2)

    print("KERNEL_OK")
</pallas_src>

<mosaic_0001>
module attributes {stable_mosaic.version = 11 : i64} {
  func.func @entity_encoder_pooler_kernel(%arg0: i32, %arg1: memref<2x8x256xbf16, #tpu.memory_space<vmem>>, %arg2: memref<2x8xf32, #tpu.memory_space<vmem>>, %arg3: memref<256x256xbf16, #tpu.memory_space<vmem>>, %arg4: memref<1x256xf32, #tpu.memory_space<vmem>>, %arg5: memref<256x256xbf16, #tpu.memory_space<vmem>>, %arg6: memref<1x256xf32, #tpu.memory_space<vmem>>, %arg7: memref<2x256xf32, #tpu.memory_space<vmem>>) attributes {dimension_semantics = [#tpu.dimension_semantics<parallel>], iteration_bounds = array<i64: 1>, scalar_prefetch = 0 : i64, scratch_operands = 0 : i64, tpu.core_type = #tpu.core_type<tc>, window_params = [{transform_indices = @transform_0, window_bounds = array<i64: 2, 8, 256>}, {transform_indices = @transform_1, window_bounds = array<i64: 2, 8>}, {pipeline_mode = #tpu.pipeline_mode<synchronous>, transform_indices = @transform_2, window_bounds = array<i64: 256, 256>}, {pipeline_mode = #tpu.pipeline_mode<synchronous>, transform_indices = @transform_3, window_bounds = array<i64: 1, 256>}, {pipeline_mode = #tpu.pipeline_mode<synchronous>, transform_indices = @transform_4, window_bounds = array<i64: 256, 256>}, {pipeline_mode = #tpu.pipeline_mode<synchronous>, transform_indices = @transform_5, window_bounds = array<i64: 1, 256>}, {transform_indices = @transform_6, window_bounds = array<i64: 2, 256>}]} {
    %c0 = arith.constant 0 : index
    %c0_0 = arith.constant 0 : index
    %c0_1 = arith.constant 0 : index
    %0 = vector.load %arg1[%c0, %c0_0, %c0_1] : memref<2x8x256xbf16, #tpu.memory_space<vmem>>, vector<2x8x256xbf16>
    %c0_2 = arith.constant 0 : index
    %c0_3 = arith.constant 0 : index
    %1 = vector.load %arg2[%c0_2, %c0_3] : memref<2x8xf32, #tpu.memory_space<vmem>>, vector<2x8xf32>
    %2 = arith.truncf %1 : vector<2x8xf32> to vector<2x8xbf16>
    %3 = vector.shape_cast %2 : vector<2x8xbf16> to vector<2x1x8xbf16>
    "tpu.trace_start"() <{level = 10 : i32, message = "bqs,bsh->bqh"}> : () -> ()
    %cst = arith.constant dense<0.000000e+00> : vector<2x1x256xf32>
    %4 = tpu.matmul %3, %0, %cst {dimension_numbers = #tpu.dot_dimension_numbers<[2], [1], [1], [2], [0, 0, 0, 1, 1, 2], [0], [0]>} : vector<2x1x8xbf16>, vector<2x8x256xbf16>, vector<2x1x256xf32> -> vector<2x1x256xf32>
    "tpu.trace_stop"() : () -> ()
    %5 = vector.shape_cast %4 : vector<2x1x256xf32> to vector<2x256xf32>
    %cst_4 = arith.constant dense<0.000000e+00> : vector<2xf32>
    %6 = vector.multi_reduction <add>, %1, %cst_4 [1] : vector<2x8xf32> to vector<2xf32>
    %7 = vector.shape_cast %6 : vector<2xf32> to vector<2x1xf32>
    %cst_5 = arith.constant 9.99999971E-10 : f32
    %8 = vector.broadcast %cst_5 : f32 to vector<2x1xf32>
    %9 = arith.maximumf %7, %8 : vector<2x1xf32>
    %cst_6 = arith.constant 1.000000e+00 : f32
    %10 = vector.broadcast %cst_6 : f32 to vector<2x1xf32>
    %11 = arith.divf %10, %9 : vector<2x1xf32>
    %12 = vector.broadcast %11 : vector<2x1xf32> to vector<2x256xf32>
    %13 = arith.mulf %5, %12 : vector<2x256xf32>
    %14 = arith.truncf %13 : vector<2x256xf32> to vector<2x256xbf16>
    %c0_7 = arith.constant 0 : index
    %c0_8 = arith.constant 0 : index
    %15 = vector.load %arg3[%c0_7, %c0_8] : memref<256x256xbf16, #tpu.memory_space<vmem>>, vector<256x256xbf16>
    %cst_9 = arith.constant dense<0.000000e+00> : vector<2x256xf32>
    %16 = tpu.matmul %14, %15, %cst_9 {dimension_numbers = #tpu.dot_dimension_numbers<[1], [0], [0], [1], [0, 0, 1, 1], [], []>} : vector<2x256xbf16>, vector<256x256xbf16>, vector<2x256xf32> -> vector<2x256xf32>
    %c0_10 = arith.constant 0 : index
    %c0_11 = arith.constant 0 : index
    %17 = vector.load %arg4[%c0_10, %c0_11] : memref<1x256xf32, #tpu.memory_space<vmem>>, vector<1x256xf32>
    %18 = vector.broadcast %17 : vector<1x256xf32> to vector<2x256xf32>
    %19 = arith.addf %16, %18 : vector<2x256xf32>
    %cst_12 = arith.constant 0.000000e+00 : f32
    %20 = vector.broadcast %cst_12 : f32 to vector<2x256xf32>
    %21 = arith.cmpf ogt, %19, %20 : vector<2x256xf32>
    %cst_13 = arith.constant 0.00999999977 : f32
    %22 = vector.broadcast %cst_13 : f32 to vector<2x256xf32>
    %23 = arith.mulf %22, %19 : vector<2x256xf32>
    %24 = arith.select %21, %19, %23 : vector<2x256xi1>, vector<2x256xf32>
    %25 = arith.truncf %24 : vector<2x256xf32> to vector<2x256xbf16>
    %c0_14 = arith.constant 0 : index
    %c0_15 = arith.constant 0 : index
    %26 = vector.load %arg5[%c0_14, %c0_15] : memref<256x256xbf16, #tpu.memory_space<vmem>>, vector<256x256xbf16>
    %cst_16 = arith.constant dense<0.000000e+00> : vector<2x256xf32>
    %27 = tpu.matmul %25, %26, %cst_16 {dimension_numbers = #tpu.dot_dimension_numbers<[1], [0], [0], [1], [0, 0, 1, 1], [], []>} : vector<2x256xbf16>, vector<256x256xbf16>, vector<2x256xf32> -> vector<2x256xf32>
    %c0_17 = arith.constant 0 : index
    %c0_18 = arith.constant 0 : index
    %28 = vector.load %arg6[%c0_17, %c0_18] : memref<1x256xf32, #tpu.memory_space<vmem>>, vector<1x256xf32>
    %29 = vector.broadcast %28 : vector<1x256xf32> to vector<2x256xf32>
    %30 = arith.addf %27, %29 : vector<2x256xf32>
    %c0_19 = arith.constant 0 : index
    %c0_20 = arith.constant 0 : index
    %31 = vector.load %arg7[%c0_19, %c0_20] : memref<2x256xf32, #tpu.memory_space<vmem>>, vector<2x256xf32>
    tpu.vector_store %arg7[%c0_19, %c0_20], %30 {strides = array<i32>} : memref<2x256xf32, #tpu.memory_space<vmem>>, vector<2x256xf32>,
    return
  }
  func.func @transform_0(%arg0: i32) -> (i32, i32, i32) {
    %c0_i32 = arith.constant 0 : i32
    %c0_i32_0 = arith.constant 0 : i32
    %c0_i32_1 = arith.constant 0 : i32
    return %arg0, %c0_i32, %c0_i32_0 : i32, i32, i32
  }
  func.func @transform_1(%arg0: i32) -> (i32, i32) {
    %c0_i32 = arith.constant 0 : i32
    %c0_i32_0 = arith.constant 0 : i32
    return %arg0, %c0_i32 : i32, i32
  }
  func.func @transform_2(%arg0: i32) -> (i32, i32) {
    %c0_i32 = arith.constant 0 : i32
    %c0_i32_0 = arith.constant 0 : i32
    %c0_i32_1 = arith.constant 0 : i32
    return %c0_i32, %c0_i32_0 : i32, i32
  }
  func.func @transform_3(%arg0: i32) -> (i32, i32) {
    %c0_i32 = arith.constant 0 : i32
    %c0_i32_0 = arith.constant 0 : i32
    %c0_i32_1 = arith.constant 0 : i32
    return %c0_i32, %c0_i32_0 : i32, i32
  }
  func.func @transform_4(%arg0: i32) -> (i32, i32) {
    %c0_i32 = arith.constant 0 : i32
    %c0_i32_0 = arith.constant 0 : i32
    %c0_i32_1 = arith.constant 0 : i32
    return %c0_i32, %c0_i32_0 : i32, i32
  }
  func.func @transform_5(%arg0: i32) -> (i32, i32) {
    %c0_i32 = arith.constant 0 : i32
    %c0_i32_0 = arith.constant 0 : i32
    %c0_i32_1 = arith.constant 0 : i32
    return %c0_i32, %c0_i32_0 : i32, i32
  }
  func.func @transform_6(%arg0: i32) -> (i32, i32) {
    %c0_i32 = arith.constant 0 : i32
    %c0_i32_0 = arith.constant 0 : i32
    return %arg0, %c0_i32 : i32, i32
  }
}

</mosaic_0001>

<bundles_post_ra>
// kernel: tpu_custom_call.1
= control target key start
LH: loop header
LB: loop body
LE: loop exit
PB: predicated region body
PF: predicated region fallthrough
CT: control target
= control target key end

     0   :  { %11 = vsyncpa [#allocation3], 0  ;;  %s1315_s0 = inlined_call_operand.hbm [shape: bf16[2,8,256], index: 0, kind: input, shape index: {}]   ;;  %s1316_s1 = inlined_call_operand.hbm [shape: f32[2,8], index: 1, kind: input, shape index: {}]   ;;  %s1317_s2 = inlined_call_operand.hbm [shape: bf16[256,256], index: 2, kind: input, shape index: {}]   ;;  %s1318_s3 = inlined_call_operand.vmem [shape: f32[1,256], index: 3, kind: input, shape index: {}]   ;;  %s1319_s4 = inlined_call_operand.hbm [shape: bf16[256,256], index: 4, kind: input, shape index: {}]   ;;  %s1320_s5 = inlined_call_operand.vmem [shape: f32[1,256], index: 5, kind: input, shape index: {}]   ;;  %s1321_s6 = inlined_call_operand.hbm [shape: f32[2,256], index: 6, kind: output, shape index: {}]  }
   0x1   :  { %12 = vsyncpa [#allocation6], 0 }
   0x2   :  { %13 = vsyncpa [#allocation9], 0  ;;  %s33_s23 = sshll.u32 %s1316_s1, 4  ;;  %s34_s23 = int_to_ptr.hbm [resolvable:$true] %s33_s23 }
   0x3   :  { %14 = vsyncpa [#allocation4], 0  ;;  %s1230_s24 = smov [#allocation5]   ;;  %s19_s28 = sshll.u32 %s1315_s0, 4  ;;  %s20_s28 = int_to_ptr.hbm [resolvable:$true] %s19_s28 }
   0x4   :  { %s35_s25 = sshll.u32 %s1230_s24, 4  ;;  %s1231_s29 = smov [#allocation2]   ;;  %s36_s25 = int_to_ptr.vmem [resolvable:$true] %s35_s25 }
   0x5   :  { %38 = dma.hbm_to_vmem [thread:$0]  %s34_s23, 32, %s36_s25, [#allocation6]  }
   0x6   :  { %s21_s30 = sshll.u32 %s1231_s29, 4  ;;  %s1232_s7 = smov 128   ;;  %s22_s30 = int_to_ptr.vmem [resolvable:$true] %s21_s30 }
   0x7   :  { %s1233_s8 = smov 8   ;;  %s43_s1 = sshll.u32 %s1317_s2, 4  ;;  %s44_s1 = int_to_ptr.hbm [resolvable:$true] %s43_s1 }
   0x8   :  { %27 = dma.hbm_to_vmem [thread:$0]  %s20_s28, 256, %s22_s30, [#allocation3], %s1232_s7, %s1232_s7, %s1233_s8  }
   0x9   :  { %s1234_s11 = smov [#allocation7]   ;;  %s58_s0 = sshll.u32 %s1319_s4, 4  ;;  %s59_s0 = int_to_ptr.hbm [resolvable:$true] %s58_s0 }
   0xa   :  { %s45_s12 = sshll.u32 %s1234_s11, 4  ;;  %s1235_s15 = smov [#allocation8]   ;;  %s46_s12 = int_to_ptr.vmem [resolvable:$true] %s45_s12 }
   0xb   :  { %51 = dma.hbm_to_vmem [thread:$0]  %s44_s1, 4096, %s46_s12, [#allocation6], %s1232_s7, %s1232_s7, %s1233_s8  }
   0xc   :  { %s60_s16 = sshll.u32 %s1235_s15, 4  ;;  %s61_s16 = int_to_ptr.vmem [resolvable:$true] %s60_s16 }
   0xd   :  { %66 = dma.hbm_to_vmem [thread:$0]  %s59_s0, 4096, %s61_s16, [#allocation9], %s1232_s7, %s1232_s7, %s1233_s8  }
   0xe   :  { %1222 = dma.done.wait [#allocation3], 256  }
   0xf   :  { %1223 = vsyncadd [#allocation3], 4294967040 }
  0x10   :  { %1224 = dma.done.wait [#allocation6], 4128  }
  0x11   :  { %1225 = vsyncadd [#allocation6], 4294963168 }
  0x12   :  { %1226 = dma.done.wait [#allocation9], 4096  }
  0x13   :  { %1227 = vsyncadd [#allocation9], 4294963200  ;;  %vm185_vm0 = vcmask 58368   ;;  %v88_v0 = vld [vmem:[#allocation5] sm:$0x3]  ;;  %v86_v1 = vld [vmem:[#allocation2] sm:$0xff] }
  0x14   :  { %v87_v2 = vld [vmem:[#allocation2 + $0x8] sm:$0xff]  ;;  %v89_v3 = vpack.c.bf16 %v88_v0, %v88_v0  ;;  %v186_v4 = vsel %vm185_vm0, %v88_v0, 0.0  ;;  %v102_v5 = vunpack.c.l.b16 %v86_v1  ;;  %v103_v6 = vunpack.c.h.b16 %v86_v1  ;;  %v831_v24 = vld [vmem:[#allocation7 + $0x70] sm:$0xf]  ;;  %v823_v36 = vld [vmem:[#allocation7 + $0x60] sm:$0xf] }
  0x15   :  { %187 = vadd.xlane.f32.xlu0 %v186_v4  ;;  %vm110_vm1 = vcmask 1043456   ;;  %v146_v7 = vunpack.c.l.b16 %v87_v2  ;;  %v147_v8 = vunpack.c.h.b16 %v87_v2  ;;  %vm92_vm2 = vcmask 1040384   ;;  %v1044_v25 = vld [vmem:[#allocation7 + $0x74] sm:$0xf0]  ;;  %v895_v26 = vld [vmem:[#allocation7 + $0xf0] sm:$0xf] }
  0x16   :  { %v91_v9 = vrot.slane %v89_v3, 3  ;;  %v104_v10 = vpack.c.b16 %v102_v5, %v102_v5  ;;  %v105_v11 = vpack.c.b16 %v103_v6, %v103_v6  ;;  %vm106_vm3 = vcmask 64512   ;;  %v1060_v28 = vld [vmem:[#allocation7 + $0xf4] sm:$0xf0]  ;;  %v1043_v29 = vld [vmem:[#allocation7 + $0x74] sm:$0xf] }
  0x17   :  { %v148_v12 = vpack.c.b16 %v146_v7, %v146_v7  ;;  %v149_v13 = vpack.c.b16 %v147_v8, %v147_v8  ;;  %v832_v27 = vor.u32 %v1044_v25, %v831_v24  ;;  %v833_v30 = vld [vmem:[#allocation7 + $0x78] sm:$0xf0]  ;;  %v896_v31 = vor.u32 %v1060_v28, %v895_v26  ;;  %v1059_v33 = vld [vmem:[#allocation7 + $0xf4] sm:$0xf]  ;;  %v1042_v37 = vld [vmem:[#allocation7 + $0x64] sm:$0xf0] }
  0x18   :  { %v112_v14 = vsel %vm110_vm1, %v104_v10, 0  ;;  %v115_v15 = vsel %vm110_vm1, %v105_v11, 0  ;;  %v95_v16 = vsel %vm92_vm2, %v89_v3, %v91_v9  ;;  %v836_v32 = vor.u32 %v1043_v29, %v833_v30  ;;  %v897_v34 = vld [vmem:[#allocation7 + $0xf8] sm:$0xf0]  ;;  %v887_v38 = vld [vmem:[#allocation7 + $0xe0] sm:$0xf] }
  0x19   :  { %124 = vmatpush.bf16.msra.mxu0 %v112_v14  ;;  %137 = vmatpush.bf16.msra.mxu1 %v115_v15  ;;  %v154_v17 = vsel %vm110_vm1, %v148_v12, 0  ;;  %v157_v18 = vsel %vm110_vm1, %v149_v13, 0  ;;  %v768_v19 = vpack.i.b16 %v95_v16, %v95_v16  ;;  %v98_v20 = vunpack.i.h.s16 %v95_v16  ;;  %v1058_v40 = vld [vmem:[#allocation7 + $0xe4] sm:$0xf0]  ;;  %v1041_v41 = vld [vmem:[#allocation7 + $0x64] sm:$0xf] }
  0x1a   :  { %166 = vmatpush.bf16.msra.mxu2 %v154_v17  ;;  %179 = vmatpush.bf16.msra.mxu3 %v157_v18  ;;  %v900_v35 = vor.u32 %v1059_v33, %v897_v34  ;;  %v824_v39 = vor.u32 %v1042_v37, %v823_v36  ;;  %v825_v42 = vld [vmem:[#allocation7 + $0x68] sm:$0xf0]  ;;  %v888_v43 = vor.u32 %v1058_v40, %v887_v38  ;;  %v1057_v45 = vld [vmem:[#allocation7 + $0xe4] sm:$0xf]  ;;  %v815_v48 = vld [vmem:[#allocation7 + $0x50] sm:$0xf] }
  0x1b   :  { %v100_v21 = vperm.slane %v768_v19, 0  ;;  %v143_v22 = vpack.i.b16 %v98_v20, %v98_v20  ;;  %v828_v44 = vor.u32 %v1041_v41, %v825_v42  ;;  %v889_v46 = vld [vmem:[#allocation7 + $0xe8] sm:$0xf0]  ;;  %v1040_v49 = vld [vmem:[#allocation7 + $0x54] sm:$0xf0]  ;;  %vm264_vm8 = vcmask 1041409  }
  0x1c   :  { %v892_v47 = vor.u32 %v1057_v45, %v889_v46  ;;  %v879_v50 = vld [vmem:[#allocation7 + $0xd0] sm:$0xf]  ;;  %v816_v51 = vor.u32 %v1040_v49, %v815_v48  ;;  %v1056_v52 = vld [vmem:[#allocation7 + $0xd4] sm:$0xf0]  ;;  %v1039_v53 = vld [vmem:[#allocation7 + $0x54] sm:$0xf] }
  0x1d   :  { %769 = vmatmul.msk.bf16.vlgmr.msra.gmra.mxu0 %vm106_vm3, %v100_v21  ;;  %770 = vmatmul.msk.bf16.vlgmr.msra.gmra.mxu1 %vm106_vm3, %v100_v21  ;;  %v144_v23 = vperm.slane %v143_v22, 0  ;;  %v817_v54 = vld [vmem:[#allocation7 + $0x58] sm:$0xf0]  ;;  %v880_v55 = vor.u32 %v1056_v52, %v879_v50  ;;  %v1055_v57 = vld [vmem:[#allocation7 + $0xd4] sm:$0xf]  ;;  %s1236_s18 = smov [#allocation10]  }
  0x1e   :  { %432 = vmatpush.bf16.msrb.mxu0 %v832_v27  ;;  %445 = vmatpush.bf16.msrb.mxu1 %v896_v31  ;;  %v820_v56 = vor.u32 %v1039_v53, %v817_v54  ;;  %v881_v58 = vld [vmem:[#allocation7 + $0xd8] sm:$0xf0]  ;;  %v807_v60 = vld [vmem:[#allocation7 + $0x40] sm:$0xf]  ;;  %v1038_v61 = vld [vmem:[#allocation7 + $0x44] sm:$0xf0] }
  0x1f   :  { %771 = vmatmul.msk.bf16.vlgmr.msra.gmra.mxu2 %vm106_vm3, %v144_v23  ;;  %772 = vmatmul.msk.bf16.vlgmr.msra.gmra.mxu3 %vm106_vm3, %v144_v23  ;;  %v884_v59 = vor.u32 %v1055_v57, %v881_v58  ;;  %v871_v62 = vld [vmem:[#allocation7 + $0xc0] sm:$0xf]  ;;  %v808_v63 = vor.u32 %v1038_v61, %v807_v60  ;;  %v1054_v0 = vld [vmem:[#allocation7 + $0xc4] sm:$0xf0]  ;;  %v1037_v1 = vld [vmem:[#allocation7 + $0x44] sm:$0xf] }
  0x20   :  { %458 = vmatpush.bf16.msrb.mxu2 %v836_v32  ;;  %471 = vmatpush.bf16.msrb.mxu3 %v900_v35  ;;  %v809_v2 = vld [vmem:[#allocation7 + $0x48] sm:$0xf0]  ;;  %v872_v3 = vor.u32 %v1054_v0, %v871_v62  ;;  %v1053_v5 = vld [vmem:[#allocation7 + $0xc4] sm:$0xf]  ;;  %v799_v8 = vld [vmem:[#allocation7 + $0x30] sm:$0xf] }
  0x21   :  { %v812_v4 = vor.u32 %v1037_v1, %v809_v2  ;;  %v873_v6 = vld [vmem:[#allocation7 + $0xc8] sm:$0xf0]  ;;  %v1036_v9 = vld [vmem:[#allocation7 + $0x34] sm:$0xf0]  ;;  %v863_v10 = vld [vmem:[#allocation7 + $0xb0] sm:$0xf] }
  0x22   :  { %433 = vmatpush.bf16.msrb.mxu0 %v824_v39  ;;  %446 = vmatpush.bf16.msrb.mxu1 %v888_v43  ;;  %v876_v7 = vor.u32 %v1053_v5, %v873_v6  ;;  %v800_v11 = vor.u32 %v1036_v9, %v799_v8  ;;  %v1052_v12 = vld [vmem:[#allocation7 + $0xb4] sm:$0xf0]  ;;  %v1035_v13 = vld [vmem:[#allocation7 + $0x34] sm:$0xf]  ;;  %v801_v14 = vld [vmem:[#allocation7 + $0x38] sm:$0xf0] }
  0x23   :  { %v864_v15 = vor.u32 %v1052_v12, %v863_v10  ;;  %v804_v16 = vor.u32 %v1035_v13, %v801_v14  ;;  %v1051_v17 = vld [vmem:[#allocation7 + $0xb4] sm:$0xf]  ;;  %v865_v18 = vld [vmem:[#allocation7 + $0xb8] sm:$0xf0]  ;;  %v791_v20 = vld [vmem:[#allocation7 + $0x20] sm:$0xf] }
  0x24   :  { %459 = vmatpush.bf16.msrb.mxu2 %v828_v44  ;;  %472 = vmatpush.bf16.msrb.mxu3 %v892_v47  ;;  %v868_v19 = vor.u32 %v1051_v17, %v865_v18  ;;  %v1034_v21 = vld [vmem:[#allocation7 + $0x24] sm:$0xf0]  ;;  %v855_v22 = vld [vmem:[#allocation7 + $0xa0] sm:$0xf]  ;;  %v1033_v25 = vld [vmem:[#allocation7 + $0x24] sm:$0xf] }
  0x25   :  { %v792_v23 = vor.u32 %v1034_v21, %v791_v20  ;;  %v1050_v24 = vld [vmem:[#allocation7 + $0xa4] sm:$0xf0]  ;;  %v793_v26 = vld [vmem:[#allocation7 + $0x28] sm:$0xf0]  ;;  %v1049_v29 = vld [vmem:[#allocation7 + $0xa4] sm:$0xf] }
  0x26   :  { %434 = vmatpush.bf16.msrb.mxu0 %v816_v51  ;;  %447 = vmatpush.bf16.msrb.mxu1 %v880_v55  ;;  %v856_v27 = vor.u32 %v1050_v24, %v855_v22  ;;  %v796_v28 = vor.u32 %v1033_v25, %v793_v26  ;;  %v857_v30 = vld [vmem:[#allocation7 + $0xa8] sm:$0xf0]  ;;  %v783_v32 = vld [vmem:[#allocation7 + $0x10] sm:$0xf]  ;;  %v1032_v33 = vld [vmem:[#allocation7 + $0x14] sm:$0xf0] }
  0x27   :  { %v860_v31 = vor.u32 %v1049_v29, %v857_v30  ;;  %v847_v34 = vld [vmem:[#allocation7 + $0x90] sm:$0xf]  ;;  %v784_v35 = vor.u32 %v1032_v33, %v783_v32  ;;  %v1048_v36 = vld [vmem:[#allocation7 + $0x94] sm:$0xf0]  ;;  %v1031_v37 = vld [vmem:[#allocation7 + $0x14] sm:$0xf] }
  0x28   :  { %460 = vmatpush.bf16.msrb.mxu2 %v820_v56  ;;  %473 = vmatpush.bf16.msrb.mxu3 %v884_v59  ;;  %v785_v38 = vld [vmem:[#allocation7 + $0x18] sm:$0xf0]  ;;  %v848_v39 = vor.u32 %v1048_v36, %v847_v34  ;;  %v1047_v41 = vld [vmem:[#allocation7 + $0x94] sm:$0xf]  ;;  %v775_v45 = vld [vmem:[#allocation7] sm:$0xf] }
  0x29   :  { %v788_v40 = vor.u32 %v1031_v37, %v785_v38  ;;  %v849_v42 = vld [vmem:[#allocation7 + $0x98] sm:$0xf0]  ;;  %v1030_v46 = vld [vmem:[#allocation7 + $0x4] sm:$0xf0]  ;;  %v839_v47 = vld [vmem:[#allocation7 + $0x80] sm:$0xf] }
  0x2a   :  { %435 = vmatpush.bf16.msrb.mxu0 %v808_v63  ;;  %448 = vmatpush.bf16.msrb.mxu1 %v872_v3  ;;  %v852_v43 = vor.u32 %v1047_v41, %v849_v42  ;;  %v776_v49 = vor.u32 %v1030_v46, %v775_v45  ;;  %v1046_v50 = vld [vmem:[#allocation7 + $0x84] sm:$0xf0]  ;;  %v1029_v51 = vld [vmem:[#allocation7 + $0x4] sm:$0xf]  ;;  %v777_v53 = vld [vmem:[#allocation7 + $0x8] sm:$0xf0] }
  0x2b   :  { %v840_v52 = vor.u32 %v1046_v50, %v839_v47  ;;  %v1045_v54 = vld [vmem:[#allocation7 + $0x84] sm:$0xf]  ;;  %v841_v55 = vld [vmem:[#allocation7 + $0x88] sm:$0xf0]  ;;  %v780_v56 = vor.u32 %v1029_v51, %v777_v53  ;;  %v959_v58 = vld [vmem:[#allocation8 + $0x70] sm:$0xf] }
  0x2c   :  { %461 = vmatpush.bf16.msrb.mxu2 %v812_v4  ;;  %474 = vmatpush.bf16.msrb.mxu3 %v876_v7  ;;  %v844_v57 = vor.u32 %v1045_v54, %v841_v55  ;;  %v1076_v59 = vld [vmem:[#allocation8 + $0x74] sm:$0xf0]  ;;  %v1075_v60 = vld [vmem:[#allocation8 + $0x74] sm:$0xf]  ;;  %v961_v62 = vld [vmem:[#allocation8 + $0x78] sm:$0xf0] }
  0x2d   :  { %v960_v61 = vor.u32 %v1076_v59, %v959_v58  ;;  %v951_v63 = vld [vmem:[#allocation8 + $0x60] sm:$0xf]  ;;  %v1074_v0 = vld [vmem:[#allocation8 + $0x64] sm:$0xf0]  ;;  %v964_v2 = vor.u32 %v1075_v60, %v961_v62  ;;  %v1073_v3 = vld [vmem:[#allocation8 + $0x64] sm:$0xf] }
  0x2e   :  { %436 = vmatpush.bf16.msrb.mxu0 %v800_v11  ;;  %449 = vmatpush.bf16.msrb.mxu1 %v864_v15  ;;  %v953_v4 = vld [vmem:[#allocation8 + $0x68] sm:$0xf0]  ;;  %v1023_v5 = vld [vmem:[#allocation8 + $0xf0] sm:$0xf]  ;;  %v952_v7 = vor.u32 %v1074_v0, %v951_v63  ;;  %v1092_v8 = vld [vmem:[#allocation8 + $0xf4] sm:$0xf0] }
  0x2f   :  { %v1091_v9 = vld [vmem:[#allocation8 + $0xf4] sm:$0xf]  ;;  %v1025_v10 = vld [vmem:[#allocation8 + $0xf8] sm:$0xf0]  ;;  %v956_v11 = vor.u32 %v1073_v3, %v953_v4  ;;  %v1024_v12 = vor.u32 %v1092_v8, %v1023_v5  ;;  %v943_v14 = vld [vmem:[#allocation8 + $0x50] sm:$0xf] }
  0x30   :  { %462 = vmatpush.bf16.msrb.mxu2 %v804_v16  ;;  %475 = vmatpush.bf16.msrb.mxu3 %v868_v19  ;;  %v1028_v13 = vor.u32 %v1091_v9, %v1025_v10  ;;  %v1072_v15 = vld [vmem:[#allocation8 + $0x54] sm:$0xf0]  ;;  %v1071_v18 = vld [vmem:[#allocation8 + $0x54] sm:$0xf]  ;;  %v945_v19 = vld [vmem:[#allocation8 + $0x58] sm:$0xf0] }
  0x31   :  { %v1015_v20 = vld [vmem:[#allocation8 + $0xe0] sm:$0xf]  ;;  %v1090_v21 = vld [vmem:[#allocation8 + $0xe4] sm:$0xf0]  ;;  %v1089_v22 = vld [vmem:[#allocation8 + $0xe4] sm:$0xf]  ;;  %v944_v24 = vor.u32 %v1072_v15, %v943_v14  ;;  %v948_v29 = vor.u32 %v1071_v18, %v945_v19 }
  0x32   :  { %437 = vmatpush.bf16.msrb.mxu0 %v792_v23  ;;  %450 = vmatpush.bf16.msrb.mxu1 %v856_v27  ;;  %v1016_v25 = vor.u32 %v1090_v21, %v1015_v20  ;;  %v1017_v26 = vld [vmem:[#allocation8 + $0xe8] sm:$0xf0]  ;;  %v935_v27 = vld [vmem:[#allocation8 + $0x40] sm:$0xf]  ;;  %v1007_v33 = vld [vmem:[#allocation8 + $0xd0] sm:$0xf] }
  0x33   :  { %v1020_v30 = vor.u32 %v1089_v22, %v1017_v26  ;;  %v937_v32 = vld [vmem:[#allocation8 + $0x48] sm:$0xf0]  ;;  %v1087_v36 = vld [vmem:[#allocation8 + $0xd4] sm:$0xf]  ;;  %v1009_v37 = vld [vmem:[#allocation8 + $0xd8] sm:$0xf0] }
  0x34   :  { %463 = vmatpush.bf16.msrb.mxu2 %v796_v28  ;;  %476 = vmatpush.bf16.msrb.mxu3 %v860_v31  ;;  %v1070_v28 = vld [vmem:[#allocation8 + $0x44] sm:$0xf0]  ;;  %v1069_v31 = vld [vmem:[#allocation8 + $0x44] sm:$0xf]  ;;  %v1012_v41 = vor.u32 %v1087_v36, %v1009_v37  ;;  %v999_v45 = vld [vmem:[#allocation8 + $0xc0] sm:$0xf] }
  0x35   :  { %v1086_v46 = vld [vmem:[#allocation8 + $0xc4] sm:$0xf0]  ;;  %v940_v50 = vor.u32 %v1069_v31, %v937_v32  ;;  %v1068_v51 = vld [vmem:[#allocation8 + $0x34] sm:$0xf0]  ;;  %v1067_v54 = vld [vmem:[#allocation8 + $0x34] sm:$0xf] }
  0x36   :  { %438 = vmatpush.bf16.msrb.mxu0 %v784_v35  ;;  %451 = vmatpush.bf16.msrb.mxu1 %v848_v39  ;;  %v1088_v35 = vld [vmem:[#allocation8 + $0xd4] sm:$0xf0]  ;;  %v929_v55 = vld [vmem:[#allocation8 + $0x38] sm:$0xf0]  ;;  %v1066_v62 = vld [vmem:[#allocation8 + $0x24] sm:$0xf0] }
  0x37   :  { %v932_v60 = vor.u32 %v1067_v54, %v929_v55  ;;  %v1065_v63 = vld [vmem:[#allocation8 + $0x24] sm:$0xf]  ;;  %v921_v0 = vld [vmem:[#allocation8 + $0x28] sm:$0xf0]  ;;  %v993_v32 = vld [vmem:[#allocation8 + $0xb8] sm:$0xf0] }
  0x38   :  { %464 = vmatpush.bf16.msrb.mxu2 %v788_v40  ;;  %477 = vmatpush.bf16.msrb.mxu3 %v852_v43  ;;  %v1008_v40 = vor.u32 %v1088_v35, %v1007_v33  ;;  %v936_v43 = vor.u32 %v1070_v28, %v935_v27  ;;  %v991_v28 = vld [vmem:[#allocation8 + $0xb0] sm:$0xf]  ;;  %v1064_v35 = vld [vmem:[#allocation8 + $0x14] sm:$0xf0]  ;;  %v1063_v36 = vld [vmem:[#allocation8 + $0x14] sm:$0xf] }
  0x39   :  { %v913_v38 = vld [vmem:[#allocation8 + $0x18] sm:$0xf0]  ;;  %v1079_v54 = vld [vmem:[#allocation8 + $0x94] sm:$0xf]  ;;  %s754_s19 = sshll.u32 %s1236_s18, 4  ;;  %s756_s22 = sshll.u32 %s1321_s6, 4  ;;  %s755_s19 = int_to_ptr.vmem [resolvable:$true] %s754_s19  ;;  %s757_s22 = int_to_ptr.hbm [resolvable:$true] %s756_s22 }
  0x3a   :  { %439 = vmatpush.bf16.msrb.mxu0 %v776_v49  ;;  %452 = vmatpush.bf16.msrb.mxu1 %v840_v52  ;;  %v1085_v52 = vld [vmem:[#allocation8 + $0xc4] sm:$0xf]  ;;  %vm745_vm11 = vcmask 1041408  }
  0x3c   :  { %465 = vmatpush.bf16.msrb.mxu2 %v780_v56  ;;  %478 = vmatpush.bf16.msrb.mxu3 %v844_v57  ;;  %v1000_v56 = vor.u32 %v1086_v46, %v999_v45  ;;  %v903_v46 = vld [vmem:[#allocation8] sm:$0xf] }
  0x3e   :  { %690 = vmatpush.bf16.msra.mxu0 %v960_v61  ;;  %703 = vmatpush.bf16.msra.mxu1 %v1024_v12  ;;  %v919_v61 = vld [vmem:[#allocation8 + $0x20] sm:$0xf] }
  0x40   :  { %716 = vmatpush.bf16.msra.mxu2 %v964_v2  ;;  %729 = vmatpush.bf16.msra.mxu3 %v1028_v13 }
  0x42   :  { %691 = vmatpush.bf16.msra.mxu0 %v952_v7  ;;  %704 = vmatpush.bf16.msra.mxu1 %v1016_v25 }
  0x44   :  { %717 = vmatpush.bf16.msra.mxu2 %v956_v11  ;;  %730 = vmatpush.bf16.msra.mxu3 %v1020_v30  ;;  %v924_v11 = vor.u32 %v1065_v63, %v921_v0  ;;  %v1083_v30 = vld [vmem:[#allocation8 + $0xb4] sm:$0xf]  ;;  %v249_v0 = vld [vmem:[%s1318_s3] sm:$0x3] }
  0x45   :  { %v996_v33 = vor.u32 %v1083_v30, %v993_v32 }
  0x46   :  { %692 = vmatpush.bf16.msra.mxu0 %v944_v24  ;;  %705 = vmatpush.bf16.msra.mxu1 %v1008_v40  ;;  %v983_v40 = vld [vmem:[#allocation8 + $0xa0] sm:$0xf] }
  0x48   :  { %718 = vmatpush.bf16.msra.mxu2 %v948_v29  ;;  %731 = vmatpush.bf16.msra.mxu3 %v1012_v41  ;;  %v1084_v29 = vld [vmem:[#allocation8 + $0xb4] sm:$0xf0]  ;;  %v1082_v41 = vld [vmem:[#allocation8 + $0xa4] sm:$0xf0] }
  0x49   :  { %v992_v31 = vor.u32 %v1084_v29, %v991_v28 }
  0x4a   :  { %693 = vmatpush.bf16.msra.mxu0 %v936_v43  ;;  %706 = vmatpush.bf16.msra.mxu1 %v1000_v56  ;;  %v984_v43 = vor.u32 %v1082_v41, %v983_v40  ;;  %v977_v56 = vld [vmem:[#allocation8 + $0x98] sm:$0xf0] }
  0x4c   :  { %719 = vmatpush.bf16.msra.mxu2 %v940_v50 }
  0x4e   :  { %707 = vmatpush.bf16.msra.mxu1 %v992_v31 }
  0x50   :  { %720 = vmatpush.bf16.msra.mxu2 %v932_v60  ;;  %v1077_v60 = vld [vmem:[#allocation8 + $0x84] sm:$0xf] }
  0x52   :  { %708 = vmatpush.bf16.msra.mxu1 %v984_v43 }
  0x54   :  { %721 = vmatpush.bf16.msra.mxu2 %v924_v11 }
  0x88   :  { %v188_v44 = vpop.xlane.xlu0 %187 }
  0x89   :  { %v1284_v48 = vmax.f32 %v188_v44, 1e-09  ;;  %v927_v44 = vld [vmem:[#allocation8 + $0x30] sm:$0xf] }
  0x8a   :  { %v928_v59 = vor.u32 %v1068_v51, %v927_v44  ;;  %v985_v44 = vld [vmem:[#allocation8 + $0xa8] sm:$0xf0] }
  0x8b   :  { %1100 = vrcp.f32 %v1284_v48  ;;  %v201_v17 = vand.u32 2147483648, %v1284_v48  ;;  %vm195_vm5 = vweird.f32 %v1284_v48  ;;  %v199_v39 = vand.u32 2147483647, %v1284_v48  ;;  %v905_v51 = vld [vmem:[#allocation8 + $0x8] sm:$0xf0] }
  0x8c   :  { %694 = vmatpush.bf16.msra.mxu0 %v928_v59  ;;  %v1078_v59 = vld [vmem:[#allocation8 + $0x84] sm:$0xf0] }
  0x8d   :  { %v202_v53 = vor.u32 1.1754944e-38, %v201_v17  ;;  %vm200_vm7 = vcmp.eq.f32.partialorder %v199_v39, 8.507059e+37  ;;  %v916_v39 = vor.u32 %v1063_v36, %v913_v38 }
  0x8f   :  { %722 = vmatpush.bf16.msra.mxu2 %v916_v39 }
  0x91   :  { %v1287_v1 = vpop.eup %1100 }
  0x92   :  { %v191_v6 = vmul.f32 %v1287_v1, %v1284_v48  ;;  %vm196_vm4 = vweird.f32 %v1287_v1  ;;  %v1001_v48 = vld [vmem:[#allocation8 + $0xc8] sm:$0xf0] }
  0x93   :  { %vm1298_vm6 = vmor %vm195_vm5, %vm196_vm4  ;;  %v1004_v57 = vor.u32 %v1085_v52, %v1001_v48  ;;  %v975_v48 = vld [vmem:[#allocation8 + $0x90] sm:$0xf] }
  0x94   :  { %v192_v16 = vsub.f32 1.0, %v191_v6  ;;  %v920_v6 = vor.u32 %v1066_v62, %v919_v61  ;;  %v969_v62 = vld [vmem:[#allocation8 + $0x88] sm:$0xf0] }
  0x95   :  { %732 = vmatpush.bf16.msra.mxu3 %v1004_v57  ;;  %v980_v57 = vor.u32 %v1079_v54, %v977_v56  ;;  %v972_v63 = vor.u32 %v1077_v60, %v969_v62 }
  0x96   :  { %v193_v23 = vmul.f32 %v1287_v1, %v192_v16  ;;  %695 = vmatpush.bf16.msra.mxu0 %v920_v6  ;;  %v252_v6 = vperm.slane %v249_v0, 1 }
  0x98   :  { %v194_v34 = vadd.f32 %v1287_v1, %v193_v23 }
  0x99   :  { %733 = vmatpush.bf16.msra.mxu3 %v996_v33 }
  0x9a   :  { %v126_v42 = vpop.f32.mrf.mxu0  ;;  %v198_v47 = vsel %vm1298_vm6, %v1287_v1, %v194_v34  ;;  %v139_v49 = vpop.f32.mrf.mxu1  ;;  %v911_v34 = vld [vmem:[#allocation8 + $0x10] sm:$0xf] }
  0x9b   :  { %v203_v58 = vsel %vm200_vm7, %v202_v53, %v198_v47  ;;  %v912_v37 = vor.u32 %v1064_v35, %v911_v34  ;;  %v1062_v47 = vld [vmem:[#allocation8 + $0x4] sm:$0xf0]  ;;  %v1080_v53 = vld [vmem:[#allocation8 + $0x94] sm:$0xf0] }
  0x9c   :  { %v209_v1 = vmul.f32 %v203_v58, %v126_v42  ;;  %v210_v2 = vmul.f32 %v203_v58, %v139_v49  ;;  %v206_v3 = vrot.slane %v203_v58, 1  ;;  %v1081_v42 = vld [vmem:[#allocation8 + $0xa4] sm:$0xf]  ;;  %v904_v50 = vor.u32 %v1062_v47, %v903_v46  ;;  %v967_v58 = vld [vmem:[#allocation8 + $0x80] sm:$0xf] }
  0x9d   :  { %696 = vmatpush.bf16.msra.mxu0 %v912_v37  ;;  %v988_v45 = vor.u32 %v1081_v42, %v985_v44  ;;  %v1061_v49 = vld [vmem:[#allocation8 + $0x4] sm:$0xf]  ;;  %v976_v55 = vor.u32 %v1080_v53, %v975_v48  ;;  %v968_v61 = vor.u32 %v1078_v59, %v967_v58 }
  0x9e   :  { %v213_v12 = vpack.c.bf16 %v209_v1, %v209_v1  ;;  %v214_v13 = vpack.c.bf16 %v210_v2, %v210_v2  ;;  %v908_v52 = vor.u32 %v1061_v49, %v905_v51  ;;  %v251_v1 = vperm.slane %v249_v0, 0 }
  0x9f   :  { %734 = vmatpush.bf16.msra.mxu3 %v988_v45  ;;  %709 = vmatpush.bf16.msra.mxu1 %v976_v55 }
  0xa0   :  { %v259_v18 = vunpack.c.l.b16 %v213_v12  ;;  %v260_v19 = vunpack.c.l.b16 %v214_v13  ;;  %723 = vmatpush.bf16.msra.mxu2 %v908_v52 }
  0xa1   :  { %697 = vmatpush.bf16.msra.mxu0 %v904_v50 }
  0xa2   :  { %v168_v4 = vpop.f32.mrf.mxu2  ;;  %v181_v5 = vpop.f32.mrf.mxu3 }
  0xa3   :  { %v211_v7 = vmul.f32 %v206_v3, %v168_v4  ;;  %v212_v8 = vmul.f32 %v206_v3, %v181_v5  ;;  %v128_v9 = vpop.f32.mrf.mxu0  ;;  %v141_v10 = vpop.f32.mrf.mxu1  ;;  %735 = vmatpush.bf16.msra.mxu3 %v980_v57  ;;  %710 = vmatpush.bf16.msra.mxu1 %v968_v61 }
  0xa5   :  { %v215_v14 = vpack.c.bf16 %v211_v7, %v211_v7  ;;  %v216_v15 = vpack.c.bf16 %v212_v8, %v212_v8 }
  0xa7   :  { %v261_v16 = vunpack.c.l.b16 %v215_v14  ;;  %v262_v17 = vunpack.c.l.b16 %v216_v15  ;;  %736 = vmatpush.bf16.msra.mxu3 %v972_v63 }
  0xa9   :  { %v263_v20 = vrot.slane %v261_v16, 7  ;;  %v266_v21 = vrot.slane %v262_v17, 7 }
  0xaa   :  { %v170_v22 = vpop.f32.mrf.mxu2  ;;  %v183_v23 = vpop.f32.mrf.mxu3 }
  0xab   :  { %v265_v24 = vsel %vm264_vm8, %v263_v20, %v259_v18  ;;  %v267_v25 = vsel %vm264_vm8, %v266_v21, %v260_v19  ;;  %v524_v23 = vld [vmem:[%s1320_s5] sm:$0x3] }
  0xac   :  { %v268_v26 = vpack.c.b16 %v265_v24, %v265_v24  ;;  %v269_v27 = vpack.c.b16 %v267_v25, %v267_v25  ;;  %v527_v25 = vperm.slane %v524_v23, 1 }
  0xae   :  { %440 = vmatmul.bf16.vlgmr.msrb.gmra.mxu0 %v268_v26  ;;  %453 = vmatmul.bf16.vlgmr.msrb.gmra.mxu1 %v269_v27 }
  0xaf   :  { %466 = vmatmul.bf16.vlgmr.msrb.gmra.mxu2 %v268_v26  ;;  %479 = vmatmul.bf16.vlgmr.msrb.gmra.mxu3 %v269_v27  ;;  %v526_v27 = vperm.slane %v524_v23, 0 }
 0x12b   :  { %v441_v2 = vpop.f32.mrf.mxu0  ;;  %v454_v3 = vpop.f32.mrf.mxu1 }
 0x12c   :  { %v442_v4 = vadd.f32 %v441_v2, %v251_v1 }
 0x12e   :  { %v455_v5 = vadd.f32 %v454_v3, %v442_v4 }
 0x130   :  { %vm484_vm9 = vcmp.gt.f32.partialorder %v455_v5, 0.0  ;;  %v486_v7 = vmul.f32 0.01, %v455_v5 }
 0x132   :  { %v488_v8 = vsel %vm484_vm9, %v455_v5, %v486_v7  ;;  %v467_v9 = vpop.f32.mrf.mxu2  ;;  %v480_v10 = vpop.f32.mrf.mxu3 }
 0x133   :  { %v490_v11 = vpack.c.bf16 %v488_v8, %v488_v8  ;;  %v468_v12 = vadd.f32 %v467_v9, %v252_v6  ;;  %v443_v13 = vpop.f32.mrf.mxu0  ;;  %v456_v14 = vpop.f32.mrf.mxu1 }
 0x135   :  { %v481_v15 = vadd.f32 %v480_v10, %v468_v12  ;;  %698 = vmatmul.bf16.vlgmr.msra.gmra.mxu0 %v490_v11  ;;  %724 = vmatmul.bf16.vlgmr.msra.gmra.mxu2 %v490_v11 }
 0x137   :  { %vm485_vm10 = vcmp.gt.f32.partialorder %v481_v15, 0.0  ;;  %v487_v16 = vmul.f32 0.01, %v481_v15 }
 0x139   :  { %v489_v17 = vsel %vm485_vm10, %v481_v15, %v487_v16 }
 0x13a   :  { %v491_v18 = vpack.c.bf16 %v489_v17, %v489_v17  ;;  %v469_v19 = vpop.f32.mrf.mxu2  ;;  %v482_v20 = vpop.f32.mrf.mxu3 }
 0x13c   :  { %711 = vmatmul.bf16.vlgmr.msra.gmra.mxu1 %v491_v18  ;;  %737 = vmatmul.bf16.vlgmr.msra.gmra.mxu3 %v491_v18 }
 0x1b2   :  { %v699_v21 = vpop.f32.mrf.mxu0 }
 0x1b3   :  { %v700_v30 = vadd.f32 %v699_v21, %v526_v27 }
 0x1b8   :  { %v725_v22 = vpop.f32.mrf.mxu2 }
 0x1b9   :  { %v712_v24 = vpop.f32.mrf.mxu1  ;;  %v726_v28 = vadd.f32 %v725_v22, %v527_v25 }
 0x1ba   :  { %v701_v26 = vpop.f32.mrf.mxu0  ;;  %v713_v34 = vadd.f32 %v712_v24, %v700_v30 }
 0x1bf   :  { %v738_v29 = vpop.f32.mrf.mxu3 }
 0x1c0   :  { %v739_v31 = vadd.f32 %v738_v29, %v726_v28  ;;  %v727_v32 = vpop.f32.mrf.mxu2 }
 0x1c1   :  { %v714_v33 = vpop.f32.mrf.mxu1 }
 0x1c2   :  { %v744_v35 = vrot.slane %v739_v31, 6 }
 0x1c4   :  { %v746_v36 = vsel %vm745_vm11, %v713_v34, %v744_v35 }
 0x1c5   :  { %748 = vst [vmem:[#allocation10] sm:$0xf] %v746_v36 }
 0x1c6   :  { %759 = dma.vmem_to_hbm [thread:$0]  %s755_s19, 64, %s757_s22, [#allocation4]  }
 0x1c7   :  { %v740_v37 = vpop.f32.mrf.mxu3 }
 0x1c8   :  { %1228 = dma.done.wait [#allocation4], 64  }
 0x1c9   :  { %1229 = vsyncadd [#allocation4], 4294967232 }
 0x1ca   :  { %764 = vsyncpa [#allocation3], 1 }
 0x1cb   :  { %765 = vsyncpa [#allocation6], 1 }
 0x1cc   :  { %766 = vsyncpa [#allocation9], 1 }
 0x1cd   :  { %767 = vsyncpa [#allocation4], 1 }

</bundles_post_ra>
